<compile_context>
chip_gen: v7x
topology: tpu7x:2x2x1
jax: 0.10.0
libtpu: 0.0.40
codegen_flags: <defaults>
</compile_context>

<pallas_src>
import jax
import jax.numpy as jnp
from jax.experimental import pallas as pl
from jax.experimental.pallas import tpu as pltpu

# ----------------------------- model dims -----------------------------------
B, C, H, W = 2, 4, 16, 16          # small NCHW input (PyTorch convention)
IN_DIM = C * H * W                 # 1024  (already a multiple of 128)
HIDDEN = 32
OUT_DIM = 10

# ------------------------ hardware-padded dims -------------------------------
HIDDEN_PAD = 128                   # full MXU lane width
OUT_PAD = 128                      # lane-dense output store
MAX_TILE_B = 256                   # fills v6e/v7x 256-row MXU; fine on v5e


def _round_up(x, m):
    return ((x + m - 1) // m) * m


def _choose_tile_b(batch):
    """Rows per batch tile (grid step).

    - tiny batches (<=16): one tile = padded batch; minimal padding, no
      per-step overhead blowup (B=2 case -> tile 8, grid (1,)).
    - larger batches: large tiles (cap 256) to fill the MXU M dimension and
      amortize ~0.35us/step pipeline overhead, capped at half the padded batch
      so the "parallel" grid has >=2 steps (engages both v7x TensorCores).
    """
    b8 = _round_up(batch, 8)
    if b8 <= 16:
        return b8
    return min(MAX_TILE_B, _round_up((b8 + 1) // 2, 8))


# ----------------------------- Pallas kernel --------------------------------
def mlp_kernel(x_ref, w1_ref, b1_ref, w2_ref, b2_ref, o_ref):
    """out = relu(x @ W1 + b1) @ W2 + b2 for one (TILE_B, IN_DIM) batch tile.

    Shapes seen by the kernel (all VMEM-resident, lane/sublane dense):
      x_ref  : (TILE_B, IN_DIM)        f32   (cast to bf16 in-kernel)
      w1_ref : (IN_DIM, HIDDEN_PAD)    bf16  (zero-padded columns)
      b1_ref : (1, HIDDEN_PAD)         f32   (zero-padded lanes)
      w2_ref : (HIDDEN_PAD, OUT_PAD)   bf16  (zero-padded rows/columns)
      b2_ref : (1, OUT_PAD)            f32   (zero-padded lanes)
      o_ref  : (TILE_B, OUT_PAD)       f32
    """
    # Cast x to bf16 on the VPU just before the MXU (hidden under the dot);
    # x is read from HBM once, in f32, with no separate wrapper-side cast pass.
    x_bf = x_ref[...].astype(jnp.bfloat16)
    h = jnp.dot(x_bf, w1_ref[...], preferred_element_type=jnp.float32)
    # (TILE_B,128) + (1,128): one VPU sublane-broadcast add per grid step.
    h = jnp.maximum(h + b1_ref[...], 0.0)
    # Second dot: bf16 activations, f32 accumulation on the MXU.
    o = jnp.dot(h.astype(jnp.bfloat16), w2_ref[...],
                preferred_element_type=jnp.float32)
    # Lane-dense (128-wide) unmasked f32 store.
    o_ref[...] = (o + b2_ref[...]).astype(o_ref.dtype)


# ----------------------------- parameter prep --------------------------------
def prepare_params(w1, b1, w2, b2):
    """One-time parameter prep (pad to MXU/lane tiles; bf16 weights).

    Hoisted out of the per-call path so the steady-state forward does no
    weight padding / casting / broadcasting.
    """
    w1p = jnp.pad(w1, ((0, 0), (0, HIDDEN_PAD - HIDDEN))).astype(jnp.bfloat16)
    w2p = jnp.pad(w2, ((0, HIDDEN_PAD - HIDDEN),
                       (0, OUT_PAD - OUT_DIM))).astype(jnp.bfloat16)
    b1p = jnp.pad(b1, ((0, 0), (0, HIDDEN_PAD - HIDDEN))).astype(jnp.float32)
    b2p = jnp.pad(b2, ((0, 0), (0, OUT_PAD - OUT_DIM))).astype(jnp.float32)
    return w1p, b1p, w2p, b2p


# ----------------------------- wrapper ---------------------------------------
def learner_forward(x_nchw, w1p, b1p, w2p, b2p):
    """Pallas-backed equivalent of Learner.forward(x).

    x_nchw : (B, C, H, W) f32
    w1p    : (IN_DIM, HIDDEN_PAD) bf16     b1p : (1, HIDDEN_PAD) f32
    w2p    : (HIDDEN_PAD, OUT_PAD) bf16    b2p : (1, OUT_PAD) f32
    returns: (B, OUT_DIM) f32
    """
    b = x_nchw.shape[0]
    x2d = x_nchw.reshape(b, -1).astype(jnp.float32)               # flatten NCHW

    tile_b = _choose_tile_b(b)
    b_pad = _round_up(b, tile_b)
    if b_pad != b:                       # only pad when the grid needs it
        x2d = jnp.pad(x2d, ((0, b_pad - b), (0, 0)))

    grid = (b_pad // tile_b,)            # batch-tile grid; >=2 steps at scale
    out_padded = pl.pallas_call(
        mlp_kernel,
        out_shape=jax.ShapeDtypeStruct((b_pad, OUT_PAD), jnp.float32),
        grid_spec=pltpu.PrefetchScalarGridSpec(
            num_scalar_prefetch=0,
            grid=grid,
            in_specs=[
                pl.BlockSpec((tile_b, IN_DIM),      lambda i: (i, 0)),  # x tile (f32)
                pl.BlockSpec((IN_DIM, HIDDEN_PAD),  lambda i: (0, 0)),  # W1 (resident)
                pl.BlockSpec((1, HIDDEN_PAD),       lambda i: (0, 0)),  # b1 row
                pl.BlockSpec((HIDDEN_PAD, OUT_PAD), lambda i: (0, 0)),  # W2 (resident)
                pl.BlockSpec((1, OUT_PAD),          lambda i: (0, 0)),  # b2 row
            ],
            out_specs=pl.BlockSpec((tile_b, OUT_PAD), lambda i: (i, 0)),
        ),
        compiler_params=pltpu.CompilerParams(
            # Batch tiles are independent -> shard across TensorCores (v7x).
            dimension_semantics=("parallel",),
        ),
    )(x2d, w1p, b1p, w2p, b2p)

    # Downstream code never sees padded rows/lanes.
    return out_padded[:b, :OUT_DIM]


# ----------------------------- param init -----------------------------------
def init_params(key):
    """Deterministic init mirroring nn.Linear's default U(-1/sqrt(fan_in), +)."""
    k1, k2, k3, k4 = jax.random.split(key, 4)
    lim1 = 1.0 / jnp.sqrt(jnp.float32(IN_DIM))
    lim2 = 1.0 / jnp.sqrt(jnp.float32(HIDDEN))
    w1 = jax.random.uniform(k1, (IN_DIM, HIDDEN), jnp.float32, -lim1, lim1)
    b1 = jax.random.uniform(k2, (1, HIDDEN), jnp.float32, -lim1, lim1)
    w2 = jax.random.uniform(k3, (HIDDEN, OUT_DIM), jnp.float32, -lim2, lim2)
    b2 = jax.random.uniform(k4, (1, OUT_DIM), jnp.float32, -lim2, lim2)
    return w1, b1, w2, b2


# TODO(synk): Learner.learn / forward_with_criterion (GradScaler, autocast,
# optimizer/scheduler stepping) are training-loop machinery with no Pallas
# forward-pass equivalent; only forward() is implemented here.

if __name__ == "__main__":
    key = jax.random.PRNGKey(0)
    kx, kp = jax.random.split(key)
    x = jax.random.normal(kx, (B, C, H, W), jnp.float32)       # NCHW input
    w1, b1, w2, b2 = init_params(kp)

    # One-time parameter prep (off the steady-state forward path).
    params = prepare_params(w1, b1, w2, b2)
    fwd = jax.jit(learner_forward)

    out = fwd(x, *params)
    out = jax.block_until_ready(out)

    # sanity check against a pure-f32 JAX reference (bf16 MXU inputs in the
    # kernel -> loose tolerance)
    x2d = x.reshape(B, -1)
    ref = jnp.maximum(x2d @ w1 + b1, 0.0) @ w2 + b2
    assert out.shape == (B, OUT_DIM)
    assert jnp.allclose(out, ref, atol=5e-2, rtol=5e-2)

    print("KERNEL_OK")
</pallas_src>

<mosaic_0001>
module attributes {stable_mosaic.version = 11 : i64} {
  func.func @mlp_kernel(%arg0: i32, %arg1: memref<8x1024xf32, #tpu.memory_space<vmem>>, %arg2: memref<1024x128xbf16, #tpu.memory_space<vmem>>, %arg3: memref<1x128xf32, #tpu.memory_space<vmem>>, %arg4: memref<128x128xbf16, #tpu.memory_space<vmem>>, %arg5: memref<1x128xf32, #tpu.memory_space<vmem>>, %arg6: memref<8x128xf32, #tpu.memory_space<vmem>>) attributes {dimension_semantics = [#tpu.dimension_semantics<parallel>], iteration_bounds = array<i64: 1>, scalar_prefetch = 0 : i64, scratch_operands = 0 : i64, tpu.core_type = #tpu.core_type<tc>, window_params = [{transform_indices = @transform_0, window_bounds = array<i64: 8, 1024>}, {pipeline_mode = #tpu.pipeline_mode<synchronous>, transform_indices = @transform_1, window_bounds = array<i64: 1024, 128>}, {pipeline_mode = #tpu.pipeline_mode<synchronous>, transform_indices = @transform_2, window_bounds = array<i64: 1, 128>}, {pipeline_mode = #tpu.pipeline_mode<synchronous>, transform_indices = @transform_3, window_bounds = array<i64: 128, 128>}, {pipeline_mode = #tpu.pipeline_mode<synchronous>, transform_indices = @transform_4, window_bounds = array<i64: 1, 128>}, {transform_indices = @transform_5, window_bounds = array<i64: 8, 128>}]} {
    %c0 = arith.constant 0 : index
    %c0_0 = arith.constant 0 : index
    %0 = vector.load %arg1[%c0, %c0_0] : memref<8x1024xf32, #tpu.memory_space<vmem>>, vector<8x1024xf32>
    %1 = arith.truncf %0 : vector<8x1024xf32> to vector<8x1024xbf16>
    %c0_1 = arith.constant 0 : index
    %c0_2 = arith.constant 0 : index
    %2 = vector.load %arg2[%c0_1, %c0_2] : memref<1024x128xbf16, #tpu.memory_space<vmem>>, vector<1024x128xbf16>
    %cst = arith.constant dense<0.000000e+00> : vector<8x128xf32>
    %3 = tpu.matmul %1, %2, %cst {dimension_numbers = #tpu.dot_dimension_numbers<[1], [0], [0], [1], [0, 0, 1, 1], [], []>} : vector<8x1024xbf16>, vector<1024x128xbf16>, vector<8x128xf32> -> vector<8x128xf32>
    %c0_3 = arith.constant 0 : index
    %c0_4 = arith.constant 0 : index
    %4 = vector.load %arg3[%c0_3, %c0_4] : memref<1x128xf32, #tpu.memory_space<vmem>>, vector<1x128xf32>
    %5 = vector.broadcast %4 : vector<1x128xf32> to vector<8x128xf32>
    %6 = arith.addf %3, %5 : vector<8x128xf32>
    %cst_5 = arith.constant 0.000000e+00 : f32
    %7 = vector.broadcast %cst_5 : f32 to vector<8x128xf32>
    %8 = arith.maximumf %6, %7 : vector<8x128xf32>
    %9 = arith.truncf %8 : vector<8x128xf32> to vector<8x128xbf16>
    %c0_6 = arith.constant 0 : index
    %c0_7 = arith.constant 0 : index
    %10 = vector.load %arg4[%c0_6, %c0_7] : memref<128x128xbf16, #tpu.memory_space<vmem>>, vector<128x128xbf16>
    %cst_8 = arith.constant dense<0.000000e+00> : vector<8x128xf32>
    %11 = tpu.matmul %9, %10, %cst_8 {dimension_numbers = #tpu.dot_dimension_numbers<[1], [0], [0], [1], [0, 0, 1, 1], [], []>} : vector<8x128xbf16>, vector<128x128xbf16>, vector<8x128xf32> -> vector<8x128xf32>
    %c0_9 = arith.constant 0 : index
    %c0_10 = arith.constant 0 : index
    %12 = vector.load %arg5[%c0_9, %c0_10] : memref<1x128xf32, #tpu.memory_space<vmem>>, vector<1x128xf32>
    %13 = vector.broadcast %12 : vector<1x128xf32> to vector<8x128xf32>
    %14 = arith.addf %11, %13 : vector<8x128xf32>
    %c0_11 = arith.constant 0 : index
    %c0_12 = arith.constant 0 : index
    %15 = vector.load %arg6[%c0_11, %c0_12] : memref<8x128xf32, #tpu.memory_space<vmem>>, vector<8x128xf32>
    tpu.vector_store %arg6[%c0_11, %c0_12], %14 {strides = array<i32>} : memref<8x128xf32, #tpu.memory_space<vmem>>, vector<8x128xf32>,
    return
  }
  func.func @transform_0(%arg0: i32) -> (i32, i32) {
    %c0_i32 = arith.constant 0 : i32
    %c0_i32_0 = arith.constant 0 : i32
    return %arg0, %c0_i32 : i32, i32
  }
  func.func @transform_1(%arg0: i32) -> (i32, i32) {
    %c0_i32 = arith.constant 0 : i32
    %c0_i32_0 = arith.constant 0 : i32
    %c0_i32_1 = arith.constant 0 : i32
    return %c0_i32, %c0_i32_0 : i32, i32
  }
  func.func @transform_2(%arg0: i32) -> (i32, i32) {
    %c0_i32 = arith.constant 0 : i32
    %c0_i32_0 = arith.constant 0 : i32
    %c0_i32_1 = arith.constant 0 : i32
    return %c0_i32, %c0_i32_0 : i32, i32
  }
  func.func @transform_3(%arg0: i32) -> (i32, i32) {
    %c0_i32 = arith.constant 0 : i32
    %c0_i32_0 = arith.constant 0 : i32
    %c0_i32_1 = arith.constant 0 : i32
    return %c0_i32, %c0_i32_0 : i32, i32
  }
  func.func @transform_4(%arg0: i32) -> (i32, i32) {
    %c0_i32 = arith.constant 0 : i32
    %c0_i32_0 = arith.constant 0 : i32
    %c0_i32_1 = arith.constant 0 : i32
    return %c0_i32, %c0_i32_0 : i32, i32
  }
  func.func @transform_5(%arg0: i32) -> (i32, i32) {
    %c0_i32 = arith.constant 0 : i32
    %c0_i32_0 = arith.constant 0 : i32
    return %arg0, %c0_i32 : i32, i32
  }
}

</mosaic_0001>

<bundles_post_ra>
// kernel: learner_forward.1
= control target key start
LH: loop header
LB: loop body
LE: loop exit
PB: predicated region body
PF: predicated region fallthrough
CT: control target
= control target key end

     0   :  { %10 = vsyncpa [#allocation3], 0  ;;  %s1141_s18 = smov [#allocation2]   ;;  %s1245_s0 = inlined_call_operand.vmem [shape: f32[8,1024], index: 0, kind: input, shape index: {}]   ;;  %s1246_s1 = inlined_call_operand.hbm [shape: bf16[1024,128], index: 1, kind: input, shape index: {}]   ;;  %s1247_s2 = inlined_call_operand.vmem [shape: f32[1,128], index: 2, kind: input, shape index: {}]   ;;  %s1248_s3 = inlined_call_operand.vmem [shape: bf16[128,128], index: 3, kind: input, shape index: {}]   ;;  %s1249_s4 = inlined_call_operand.vmem [shape: f32[1,128], index: 4, kind: input, shape index: {}]   ;;  %s1250_s5 = inlined_call_operand.vmem [shape: f32[8,128], index: 5, kind: output, shape index: {}]  }
   0x1   :  { %s18_s19 = sshll.u32 %s1141_s18, 4  ;;  %s1117_s22 = scalar_lea.hbm %s1246_s1, 8192  ;;  %s19_s19 = int_to_ptr.vmem [resolvable:$true] %s18_s19 }
   0x2   :  { %p1118_p0 = scmp.ne.s32.totalorder %s1246_s1, %s1117_s22  ;;  %p1121_p1 = scmp.lt.u32.totalorder %s1117_s22, %s1246_s1 }
   0x4   :  { %p1123_p2 = pnand %p1121_p1, %p1118_p0 }
   0x6   :  { %1126 = shalt.err (!%p1123_p2)
}
   0x7   :  { %s1127_s27 = scalar_lea.vmem %s19_s19, 8192  ;;  %p1132_p4 = scmp.lt.s32.totalorder %s19_s19, %s19_s19 }
   0x8   :  { %p1128_p3 = scmp.ne.s32.totalorder %s19_s19, %s1127_s27  ;;  %p1133_p5 = scmp.lt.s32.totalorder %s1127_s27, %s1127_s27 }
   0xa   :  { %p1134_p6 = por %p1133_p5, %p1132_p4 }
   0xc   :  { %p1135_p7 = pnand %p1134_p6, %p1128_p3 }
   0xe   :  { %1138 = shalt.err (!%p1135_p7)
}
   0xf   :  { %s1142_s28 = smov 64   ;;  %s1143_s29 = smov 4  }
  0x10   :  { %24 = dma.hbm_to_vmem [thread:$0]  %s1246_s1, 8192, %s19_s19, [#allocation3], %s1142_s28, %s1142_s28, %s1143_s29  }
  0x11   :  { %1139 = dma.done.wait [#allocation3], 8192  }
  0x12   :  { %1140 = vsyncadd [#allocation3], 4294959104  ;;  %v1045_v0 = vld [vmem:[#allocation2 + $0x40] sm:$0xff]   ;;  %v1049_v4 = vld [vmem:[#allocation2 + $0x48] sm:$0xff]   ;;  %vm1145_vm0 = vmmov 0  }
  0x13   :  { %v1046_v1 = vld [vmem:[#allocation2 + $0xc0] sm:$0xff]   ;;  %923 = vmatprep.subr.bf16.mxu0 %v1045_v0  ;;  %v1050_v5 = vld [vmem:[#allocation2 + $0xc8] sm:$0xff]   ;;  %v1053_v8 = vld [vmem:[#allocation2 + $0x50] sm:$0xff]  }
  0x14   :  { %v1047_v2 = vld [vmem:[#allocation2] sm:$0xff]   ;;  %945 = vmatprep.subr.bf16.mxu1 %v1046_v1  ;;  %v1051_v6 = vld [vmem:[#allocation2 + $0x8] sm:$0xff]   ;;  %v1054_v9 = vld [vmem:[#allocation2 + $0xd0] sm:$0xff]  }
  0x15   :  { %v1048_v3 = vld [vmem:[#allocation2 + $0x80] sm:$0xff]   ;;  %924 = vmatpush3.bf16.msra.mxu0 %v1047_v2  ;;  %v1052_v7 = vld [vmem:[#allocation2 + $0x88] sm:$0xff]   ;;  %v1055_v10 = vld [vmem:[#allocation2 + $0x10] sm:$0xff]  }
  0x16   :  { %946 = vmatpush3.bf16.msra.mxu1 %v1048_v3  ;;  %925 = vmatprep.subr.bf16.mxu0 %v1049_v4  ;;  %v1056_v11 = vld [vmem:[#allocation2 + $0x90] sm:$0xff]   ;;  %v1057_v12 = vld [vmem:[#allocation2 + $0x58] sm:$0xff]   ;;  %v1061_v16 = vld [vmem:[#allocation2 + $0x60] sm:$0xff]  }
  0x17   :  { %947 = vmatprep.subr.bf16.mxu1 %v1050_v5  ;;  %v1058_v13 = vld [vmem:[#allocation2 + $0xd8] sm:$0xff]   ;;  %v1062_v17 = vld [vmem:[#allocation2 + $0xe0] sm:$0xff]   ;;  %v1065_v20 = vld [vmem:[#allocation2 + $0x68] sm:$0xff]  }
  0x18   :  { %v1059_v14 = vld [vmem:[#allocation2 + $0x18] sm:$0xff]   ;;  %v1063_v18 = vld [vmem:[#allocation2 + $0x20] sm:$0xff]   ;;  %v1066_v21 = vld [vmem:[#allocation2 + $0xe8] sm:$0xff]  }
  0x19   :  { %926 = vmatpush3.bf16.msra.mxu0 %v1051_v6  ;;  %v1060_v15 = vld [vmem:[#allocation2 + $0x98] sm:$0xff]   ;;  %v1064_v19 = vld [vmem:[#allocation2 + $0xa0] sm:$0xff]   ;;  %v1067_v22 = vld [vmem:[#allocation2 + $0x28] sm:$0xff]  }
  0x1a   :  { %948 = vmatpush3.bf16.msra.mxu1 %v1052_v7  ;;  %927 = vmatprep.subr.bf16.mxu0 %v1053_v8  ;;  %v1068_v23 = vld [vmem:[#allocation2 + $0xa8] sm:$0xff]   ;;  %v1069_v24 = vld [vmem:[#allocation2 + $0x70] sm:$0xff]   ;;  %v1073_v28 = vld [vmem:[#allocation2 + $0x78] sm:$0xff]  }
  0x1b   :  { %949 = vmatprep.subr.bf16.mxu1 %v1054_v9  ;;  %v1070_v25 = vld [vmem:[#allocation2 + $0xf0] sm:$0xff]   ;;  %v1074_v29 = vld [vmem:[#allocation2 + $0xf8] sm:$0xff]   ;;  %v36_v32 = vld [vmem:[%s1245_s0 + $0x8] sm:$0xff] }
  0x1c   :  { %v1071_v26 = vld [vmem:[#allocation2 + $0x30] sm:$0xff]   ;;  %v1075_v30 = vld [vmem:[#allocation2 + $0x38] sm:$0xff]   ;;  %v35_v34 = vld [vmem:[%s1245_s0] sm:$0xff]  ;;  %v44_v35 = vpack.c.bf16 %v36_v32, %v36_v32 }
  0x1d   :  { %928 = vmatpush3.bf16.msra.mxu0 %v1055_v10  ;;  %v1072_v27 = vld [vmem:[#allocation2 + $0xb0] sm:$0xff]   ;;  %v1076_v31 = vld [vmem:[#allocation2 + $0xb8] sm:$0xff]   ;;  %v43_v37 = vpack.c.bf16 %v35_v34, %v35_v34  ;;  %v1077_v40 = vld [vmem:[#allocation2 + $0x140] sm:$0xff]  }
  0x1e   :  { %950 = vmatpush3.bf16.msra.mxu1 %v1056_v11  ;;  %929 = vmatprep.subr.bf16.mxu0 %v1057_v12  ;;  %v38_v33 = vld [vmem:[%s1245_s0 + $0x18] sm:$0xff]  ;;  %v37_v38 = vld [vmem:[%s1245_s0 + $0x10] sm:$0xff]  ;;  %v1078_v41 = vld [vmem:[#allocation2 + $0x1c0] sm:$0xff]  }
  0x1f   :  { %951 = vmatprep.subr.bf16.mxu1 %v1058_v13  ;;  %v46_v36 = vpack.c.bf16 %v38_v33, %v38_v33  ;;  %v45_v39 = vpack.c.bf16 %v37_v38, %v37_v38  ;;  %602 = vmatprep.mubr.bf16.mxu0 %v44_v35  ;;  %v1079_v42 = vld [vmem:[#allocation2 + $0x100] sm:$0xff]   ;;  %v1081_v44 = vld [vmem:[#allocation2 + $0x148] sm:$0xff]   ;;  %v1085_v48 = vld [vmem:[#allocation2 + $0x150] sm:$0xff]  }
  0x20   :  { %v1080_v43 = vld [vmem:[#allocation2 + $0x180] sm:$0xff]   ;;  %v1082_v45 = vld [vmem:[#allocation2 + $0x1c8] sm:$0xff]   ;;  %v1086_v49 = vld [vmem:[#allocation2 + $0x1d0] sm:$0xff]  }
  0x21   :  { %930 = vmatpush3.bf16.msra.mxu0 %v1059_v14  ;;  %642 = vmatprep.mubr.bf16.mxu1 %v46_v36  ;;  %v1083_v46 = vld [vmem:[#allocation2 + $0x108] sm:$0xff]   ;;  %v1087_v50 = vld [vmem:[#allocation2 + $0x110] sm:$0xff]   ;;  %v1089_v52 = vld [vmem:[#allocation2 + $0x158] sm:$0xff]  }
  0x22   :  { %952 = vmatpush3.bf16.msra.mxu1 %v1060_v15  ;;  %931 = vmatprep.subr.bf16.mxu0 %v1061_v16  ;;  %v1084_v47 = vld [vmem:[#allocation2 + $0x188] sm:$0xff]   ;;  %v1088_v51 = vld [vmem:[#allocation2 + $0x190] sm:$0xff]   ;;  %v1090_v53 = vld [vmem:[#allocation2 + $0x1d8] sm:$0xff]  }
  0x23   :  { %953 = vmatprep.subr.bf16.mxu1 %v1062_v17  ;;  %v1091_v54 = vld [vmem:[#allocation2 + $0x118] sm:$0xff]   ;;  %v1093_v56 = vld [vmem:[#allocation2 + $0x160] sm:$0xff]   ;;  %v1097_v60 = vld [vmem:[#allocation2 + $0x168] sm:$0xff]   ;;  %v1144_v17 = vmov 0.0  }
  0x24   :  { %v1092_v55 = vld [vmem:[#allocation2 + $0x198] sm:$0xff]   ;;  %v1094_v57 = vld [vmem:[#allocation2 + $0x1e0] sm:$0xff]   ;;  %v1098_v61 = vld [vmem:[#allocation2 + $0x1e8] sm:$0xff]  }
  0x25   :  { %932 = vmatpush3.bf16.msra.mxu0 %v1063_v18  ;;  %v1095_v58 = vld [vmem:[#allocation2 + $0x120] sm:$0xff]   ;;  %v1099_v62 = vld [vmem:[#allocation2 + $0x128] sm:$0xff]   ;;  %v1101_v0 = vld [vmem:[#allocation2 + $0x170] sm:$0xff]  }
  0x26   :  { %954 = vmatpush3.bf16.msra.mxu1 %v1064_v19  ;;  %933 = vmatprep.subr.bf16.mxu0 %v1065_v20  ;;  %v1096_v59 = vld [vmem:[#allocation2 + $0x1a0] sm:$0xff]   ;;  %v1100_v63 = vld [vmem:[#allocation2 + $0x1a8] sm:$0xff]   ;;  %v1102_v1 = vld [vmem:[#allocation2 + $0x1f0] sm:$0xff]  }
  0x27   :  { %955 = vmatprep.subr.bf16.mxu1 %v1066_v21  ;;  %v1103_v2 = vld [vmem:[#allocation2 + $0x130] sm:$0xff]   ;;  %v1105_v4 = vld [vmem:[#allocation2 + $0x178] sm:$0xff]   ;;  %v40_v8 = vld [vmem:[%s1245_s0 + $0x28] sm:$0xff] }
  0x28   :  { %v1104_v3 = vld [vmem:[#allocation2 + $0x1b0] sm:$0xff]   ;;  %v1106_v5 = vld [vmem:[#allocation2 + $0x1f8] sm:$0xff]   ;;  %v48_v10 = vpack.c.bf16 %v40_v8, %v40_v8  ;;  %v39_v12 = vld [vmem:[%s1245_s0 + $0x20] sm:$0xff] }
  0x29   :  { %934 = vmatpush3.bf16.msra.mxu0 %v1067_v22  ;;  %v1107_v6 = vld [vmem:[#allocation2 + $0x138] sm:$0xff]   ;;  %v41_v13 = vld [vmem:[%s1245_s0 + $0x30] sm:$0xff]  ;;  %v47_v14 = vpack.c.bf16 %v39_v12, %v39_v12  ;;  %v1109_v16 = vld [vmem:[%s1248_s3] sm:$0xff]  }
  0x2a   :  { %956 = vmatpush3.bf16.msra.mxu1 %v1068_v23  ;;  %935 = vmatprep.subr.bf16.mxu0 %v1069_v24  ;;  %v1108_v7 = vld [vmem:[#allocation2 + $0x1b8] sm:$0xff]   ;;  %v49_v15 = vpack.c.bf16 %v41_v13, %v41_v13  ;;  %v1110_v18 = vld [vmem:[%s1248_s3 + $0x8] sm:$0xff]   ;;  %v1111_v19 = vld [vmem:[%s1248_s3 + $0x10] sm:$0xff]  }
  0x2b   :  { %957 = vmatprep.subr.bf16.mxu1 %v1070_v25  ;;  %v42_v9 = vld [vmem:[%s1245_s0 + $0x38] sm:$0xff]  ;;  %v1113_v21 = vld [vmem:[%s1248_s3 + $0x20] sm:$0xff]   ;;  %v1114_v22 = vld [vmem:[%s1248_s3 + $0x28] sm:$0xff]  }
  0x2c   :  { %v50_v11 = vpack.c.bf16 %v42_v9, %v42_v9  ;;  %v1112_v20 = vld [vmem:[%s1248_s3 + $0x18] sm:$0xff]   ;;  %v1115_v23 = vld [vmem:[%s1248_s3 + $0x30] sm:$0xff]  }
  0x2d   :  { %936 = vmatpush3.bf16.msra.mxu0 %v1071_v26  ;;  %v1116_v24 = vld [vmem:[%s1248_s3 + $0x38] sm:$0xff]  }
  0x2e   :  { %958 = vmatpush3.bf16.msra.mxu1 %v1072_v27  ;;  %937 = vmatprep.subr.bf16.mxu0 %v1073_v28  ;;  %v849_v27 = vld [vmem:[%s1247_s2] ss:$0 sm:$0xff] }
  0x2f   :  { %959 = vmatprep.subr.bf16.mxu1 %v1074_v29 }
  0x31   :  { %938 = vmatpush3.bf16.msra.mxu0 %v1075_v30 }
  0x32   :  { %960 = vmatpush3.bf16.msra.mxu1 %v1076_v31  ;;  %967 = vmatprep.subr.bf16.mxu0 %v1077_v40 }
  0x33   :  { %989 = vmatprep.subr.bf16.mxu1 %v1078_v41 }
  0x34   :  { %603 = vmatmul.mubr.bf16.vlgmr.msra.gmra.mrb[0].mxu0 %v43_v37 }
  0x35   :  { %643 = vmatmul.mubr.bf16.vlgmr.msra.gmra.mrb[0].mxu1 %v45_v39  ;;  %968 = vmatpush3.bf16.msra.mxu0 %v1079_v42 }
  0x36   :  { %990 = vmatpush3.bf16.msra.mxu1 %v1080_v43  ;;  %969 = vmatprep.subr.bf16.mxu0 %v1081_v44 }
  0x37   :  { %991 = vmatprep.subr.bf16.mxu1 %v1082_v45  ;;  %682 = vmatprep.mubr.bf16.mxu0 %v48_v10 }
  0x38   :  { %722 = vmatprep.mubr.bf16.mxu1 %v50_v11 }
  0x39   :  { %970 = vmatpush3.bf16.msra.mxu0 %v1083_v46 }
  0x3a   :  { %992 = vmatpush3.bf16.msra.mxu1 %v1084_v47  ;;  %971 = vmatprep.subr.bf16.mxu0 %v1085_v48 }
  0x3b   :  { %993 = vmatprep.subr.bf16.mxu1 %v1086_v49 }
  0x3d   :  { %972 = vmatpush3.bf16.msra.mxu0 %v1087_v50 }
  0x3e   :  { %994 = vmatpush3.bf16.msra.mxu1 %v1088_v51  ;;  %973 = vmatprep.subr.bf16.mxu0 %v1089_v52  ;;  %v914_v52 = vld [vmem:[%s1249_s4] ss:$0 sm:$0xff] }
  0x3f   :  { %995 = vmatprep.subr.bf16.mxu1 %v1090_v53 }
  0x41   :  { %974 = vmatpush3.bf16.msra.mxu0 %v1091_v54 }
  0x42   :  { %996 = vmatpush3.bf16.msra.mxu1 %v1092_v55  ;;  %975 = vmatprep.subr.bf16.mxu0 %v1093_v56 }
  0x43   :  { %997 = vmatprep.subr.bf16.mxu1 %v1094_v57 }
  0x45   :  { %976 = vmatpush3.bf16.msra.mxu0 %v1095_v58 }
  0x46   :  { %998 = vmatpush3.bf16.msra.mxu1 %v1096_v59  ;;  %977 = vmatprep.subr.bf16.mxu0 %v1097_v60 }
  0x47   :  { %999 = vmatprep.subr.bf16.mxu1 %v1098_v61 }
  0x49   :  { %978 = vmatpush3.bf16.msra.mxu0 %v1099_v62 }
  0x4a   :  { %1000 = vmatpush3.bf16.msra.mxu1 %v1100_v63  ;;  %979 = vmatprep.subr.bf16.mxu0 %v1101_v0 }
  0x4b   :  { %1001 = vmatprep.subr.bf16.mxu1 %v1102_v1 }
  0x4d   :  { %980 = vmatpush3.bf16.msra.mxu0 %v1103_v2 }
  0x4e   :  { %1002 = vmatpush3.bf16.msra.mxu1 %v1104_v3  ;;  %981 = vmatprep.subr.bf16.mxu0 %v1105_v4 }
  0x4f   :  { %1003 = vmatprep.subr.bf16.mxu1 %v1106_v5 }
  0x51   :  { %982 = vmatpush3.bf16.msra.mxu0 %v1107_v6 }
  0x52   :  { %1004 = vmatpush3.bf16.msra.mxu1 %v1108_v7  ;;  %1020 = vmatprep.subr.bf16.mxu0 %v1144_v17 }
  0x54   :  { %683 = vmatmul.mubr.bf16.vlgmr.msra.gmra.mrb[4].mxu0 %v47_v14 }
  0x55   :  { %723 = vmatmul.mubr.bf16.vlgmr.msra.gmra.mrb[4].mxu1 %v49_v15  ;;  %1021 = vmatpush3.bf16.msra.mxu0 %v1109_v16 }
  0x56   :  { %1022 = vmatprep.subr.bf16.mxu0 %v1144_v17  ;;  %1036 = vmatprep.mubr.msk.bf16.mxu0 %vm1145_vm0, %v1144_v17 }
  0x59   :  { %1023 = vmatpush3.bf16.msra.mxu0 %v1110_v18 }
  0x5a   :  { %1024 = vmatprep.subr.bf16.mxu0 %v1144_v17 }
  0x5d   :  { %1025 = vmatpush3.bf16.msra.mxu0 %v1111_v19 }
  0x5e   :  { %1026 = vmatprep.subr.bf16.mxu0 %v1144_v17 }
  0x61   :  { %1027 = vmatpush3.bf16.msra.mxu0 %v1112_v20 }
  0x62   :  { %1028 = vmatprep.subr.bf16.mxu0 %v1144_v17 }
  0x65   :  { %1029 = vmatpush3.bf16.msra.mxu0 %v1113_v21 }
  0x66   :  { %1030 = vmatprep.subr.bf16.mxu0 %v1144_v17 }
  0x69   :  { %1031 = vmatpush3.bf16.msra.mxu0 %v1114_v22 }
  0x6a   :  { %1032 = vmatprep.subr.bf16.mxu0 %v1144_v17 }
  0x6d   :  { %1033 = vmatpush3.bf16.msra.mxu0 %v1115_v23 }
  0x6e   :  { %1034 = vmatprep.subr.bf16.mxu0 %v1144_v17 }
  0x71   :  { %1035 = vmatpush3.bf16.msra.mxu0 %v1116_v24 }
 0x107   :  { %v939_v25 = vpop.f32.mrb[0].mxu0 }
 0x108   :  { %v961_v26 = vpop.f32.mrb[0].mxu1  ;;  %v940_v28 = vpop.f32.mrb[1].mxu0 }
 0x109   :  { %v962_v29 = vpop.f32.mrb[1].mxu1  ;;  %v941_v30 = vadd.f32 %v940_v28, %v939_v25  ;;  %v942_v32 = vpop.f32.mrb[2].mxu0 }
 0x10a   :  { %v963_v31 = vadd.f32 %v962_v29, %v961_v26  ;;  %v964_v33 = vpop.f32.mrb[2].mxu1  ;;  %v943_v34 = vpop.f32.mrb[3].mxu0 }
 0x10b   :  { %v965_v35 = vpop.f32.mrb[3].mxu1  ;;  %v605_v36 = vadd.f32 %v941_v30, %v849_v27 }
 0x10d   :  { %v645_v37 = vadd.f32 %v963_v31, %v605_v36 }
 0x127   :  { %v983_v38 = vpop.f32.mrb[4].mxu0 }
 0x128   :  { %v1005_v39 = vpop.f32.mrb[4].mxu1  ;;  %v984_v40 = vpop.f32.mrb[5].mxu0 }
 0x129   :  { %v985_v41 = vadd.f32 %v984_v40, %v983_v38  ;;  %v1006_v42 = vpop.f32.mrb[5].mxu1  ;;  %v986_v43 = vpop.f32.mrb[6].mxu0 }
 0x12a   :  { %v1007_v44 = vadd.f32 %v1006_v42, %v1005_v39  ;;  %v1008_v45 = vpop.f32.mrb[6].mxu1  ;;  %v987_v46 = vpop.f32.mrb[7].mxu0 }
 0x12b   :  { %v685_v47 = vadd.f32 %v985_v41, %v645_v37  ;;  %v1009_v48 = vpop.f32.mrb[7].mxu1 }
 0x12d   :  { %v725_v49 = vadd.f32 %v1007_v44, %v685_v47 }
 0x12f   :  { %v730_v50 = vmax.f32 %v725_v49, 0.0 }
 0x131   :  { %v731_v51 = vpack.c.bf16 %v730_v50, %v730_v50 }
 0x133   :  { %1037 = vmatmul.mubr.bf16.vlgmr.msra.gmra.mrb[8].mxu0 %v731_v51 }
 0x206   :  { %v837_v53 = vpop.f32.mrb[8].mxu0 }
 0x207   :  { %v838_v54 = vadd.f32 %v914_v52, %v837_v53  ;;  %v1038_v55 = vpop.f32.mrb[9].mxu0 }
 0x208   :  { %v840_v56 = vpop.f32.mrb[10].mxu0 }
 0x209   :  { %843 = vst [vmem:[%s1250_s5] sm:$0xff] %v838_v54  ;;  %v1039_v57 = vpop.f32.mrb[11].mxu0 }
 0x20a   :  { %848 = vsyncpa [#allocation3], 1 }

</bundles_post_ra>
